<compile_context>
chip_gen: v5e
topology: v5e:2x2
jax: 0.10.0
libtpu: 0.0.40
codegen_flags: <defaults>
</compile_context>

<pallas_src>
import functools

import jax
import jax.numpy as jnp
from jax.experimental import pallas as pl
from jax.experimental.pallas import tpu as pltpu

C_SEQ, C_SHP, C_HM = 12, 8, 8
IN_FEATS = C_SEQ + C_SHP + C_HM        # 28, matches nn.Linear(28, 18)
OUT_FEATS = 18                         # matches nn.Linear(..., 18)
OUT_PAD = 128                          # lane-dense padded output width
_NEG_BIG = -1e30                       # pad-lane bias -> softmax pad lanes == 0


def task_gate_kernel(seq_ref, shp_ref, hm_ref, wseq_ref, wshp_ref, whm_ref,
                     b_ref, out_ref, *, n_rows, tile_n):
    # Pool + Linear folded into one lane-dense matmul per input (see wrapper).
    logits = (
        jnp.dot(seq_ref[...], wseq_ref[...], preferred_element_type=jnp.float32)
        + jnp.dot(shp_ref[...], wshp_ref[...], preferred_element_type=jnp.float32)
        + jnp.dot(hm_ref[...], whm_ref[...], preferred_element_type=jnp.float32)
        + b_ref[...]
    )                                                       # (TN, 128)

    if n_rows % tile_n:
        # Tail tile: out-of-range rows are dropped on writeback, but keep them
        # finite so no inf/nan is ever produced from garbage reads.
        row = jax.lax.broadcasted_iota(jnp.int32, logits.shape, 0)
        valid = (pl.program_id(0) * tile_n + row) < n_rows
        logits = jnp.where(valid, logits, 0.0)

    # Numerically stable softmax over the 18 real lanes (pad lanes carry a
    # -1e30 bias so they contribute exactly 0 to the sum and the output).
    m = jnp.max(logits, axis=1, keepdims=True)
    e = jnp.exp(logits - m)
    s = jnp.sum(e, axis=1, keepdims=True)
    inv = pl.reciprocal(s, approx=True)                     # EUP slot
    out_ref[...] = (e * inv).astype(out_ref.dtype)


def _expand_weight(w_rows, length):
    """(C, 18) weight rows -> (C*length, 128): each row repeated `length`
    times and pre-scaled by 1/length (folds the mean pool into the matmul),
    output dim zero-padded 18 -> 128 lanes."""
    w = jnp.repeat(w_rows, length, axis=0) / jnp.float32(length)
    return jnp.pad(w, ((0, 0), (0, OUT_PAD - OUT_FEATS)))


def _choose_tile_n(n, bytes_per_row, vmem_budget_bytes=24 * 1024 * 1024):
    """Largest batch tile whose double-buffered in/out tiles fit the budget
    (v7x has only ~32 MiB scoped VMEM), capped at 1024 rows."""
    tn = vmem_budget_bytes // (2 * bytes_per_row)
    tn = max(8, min(1024, (tn // 8) * 8))
    if n <= tn:
        return n            # single full-extent block (also covers tiny N)
    return tn


def task_gate(seq, shp, h_m, weight, bias):
    """seq: (N, 12, L1), shp: (N, 8, L2), h_m: (N, 8, L3),
    weight: (18, 28) (PyTorch Linear layout), bias: (18,). Returns (N, 18)."""
    n = seq.shape[0]
    assert seq.shape[1] == C_SEQ and shp.shape[1] == C_SHP and h_m.shape[1] == C_HM
    l_seq, l_shp, l_hm = seq.shape[2], shp.shape[2], h_m.shape[2]

    # Flatten NCL -> (N, C*L) so the lane (last) dim is large and dense.
    seq_f = seq.reshape(n, C_SEQ * l_seq).astype(jnp.float32)
    shp_f = shp.reshape(n, C_SHP * l_shp).astype(jnp.float32)
    hm_f = h_m.reshape(n, C_HM * l_hm).astype(jnp.float32)

    wt = weight.astype(jnp.float32).T                       # (28, 18)
    w_seq = _expand_weight(wt[:C_SEQ], l_seq)               # (12*L1, 128)
    w_shp = _expand_weight(wt[C_SEQ:C_SEQ + C_SHP], l_shp)  # (8*L2, 128)
    w_hm = _expand_weight(wt[C_SEQ + C_SHP:], l_hm)         # (8*L3, 128)
    b_pad = jnp.pad(bias.astype(jnp.float32).reshape(1, OUT_FEATS),
                    ((0, 0), (0, OUT_PAD - OUT_FEATS)),
                    constant_values=_NEG_BIG)               # (1, 128)

    bytes_per_row = 4 * (seq_f.shape[1] + shp_f.shape[1] + hm_f.shape[1] + OUT_PAD)
    tn = _choose_tile_n(n, bytes_per_row)
    grid = (pl.cdiv(n, tn),)

    kernel = functools.partial(task_gate_kernel, n_rows=n, tile_n=tn)

    out = pl.pallas_call(
        kernel,
        out_shape=jax.ShapeDtypeStruct((n, OUT_PAD), jnp.float32),
        grid_spec=pltpu.PrefetchScalarGridSpec(
            num_scalar_prefetch=0,
            grid=grid,
            in_specs=[
                # Batch-tiled activations (double-buffered by the pipeline).
                pl.BlockSpec((tn, seq_f.shape[1]), lambda i: (i, 0)),
                pl.BlockSpec((tn, shp_f.shape[1]), lambda i: (i, 0)),
                pl.BlockSpec((tn, hm_f.shape[1]), lambda i: (i, 0)),
                # Grid-invariant weights/bias: DMA'd once, stay resident.
                pl.BlockSpec((w_seq.shape[0], OUT_PAD), lambda i: (0, 0)),
                pl.BlockSpec((w_shp.shape[0], OUT_PAD), lambda i: (0, 0)),
                pl.BlockSpec((w_hm.shape[0], OUT_PAD), lambda i: (0, 0)),
                pl.BlockSpec((1, OUT_PAD), lambda i: (0, 0)),
            ],
            out_specs=pl.BlockSpec((tn, OUT_PAD), lambda i: (i, 0)),
        ),
        compiler_params=pltpu.CompilerParams(
            dimension_semantics=("parallel",),               # megacore on v7x
            vmem_limit_bytes=32 * 1024 * 1024,
        ),
    )(seq_f, shp_f, hm_f, w_seq, w_shp, w_hm, b_pad)

    return out[:, :OUT_FEATS]


if __name__ == "__main__":
    key = jax.random.PRNGKey(0)
    k1, k2, k3, k4, k5 = jax.random.split(key, 5)

    N = 2
    L_SEQ, L_SHP, L_HM = 16, 24, 10       # AdaptiveAvgPool1d handles any L
    seq = jax.random.normal(k1, (N, C_SEQ, L_SEQ), jnp.float32)
    shp = jax.random.normal(k2, (N, C_SHP, L_SHP), jnp.float32)
    h_m = jax.random.normal(k3, (N, C_HM, L_HM), jnp.float32)

    # Deterministic Linear(28, 18) params (PyTorch-style uniform init bounds).
    bound = 1.0 / float(IN_FEATS) ** 0.5
    weight = jax.random.uniform(k4, (OUT_FEATS, IN_FEATS), jnp.float32, -bound, bound)
    bias = jax.random.uniform(k5, (OUT_FEATS,), jnp.float32, -bound, bound)

    w = task_gate(seq, shp, h_m, weight, bias)
    jax.block_until_ready(w)

    # Pure-JAX reference for correctness.
    x = jnp.concatenate([seq.mean(-1), shp.mean(-1), h_m.mean(-1)], axis=1)  # (N, 28)
    ref = jax.nn.softmax(x @ weight.T + bias, axis=1)                        # (N, 18)
    assert w.shape == (N, OUT_FEATS)
    # approx reciprocal in the softmax -> ~1e-4 relative deviation is expected
    assert jnp.allclose(w, ref, atol=1e-3), "Pallas kernel mismatch vs reference"

    print("KERNEL_OK")
</pallas_src>

<mosaic_0001>
module attributes {stable_mosaic.version = 11 : i64} {
  func.func @task_gate_kernel(%arg0: i32, %arg1: memref<2x192xf32, #tpu.memory_space<vmem>>, %arg2: memref<2x192xf32, #tpu.memory_space<vmem>>, %arg3: memref<2x80xf32, #tpu.memory_space<vmem>>, %arg4: memref<192x128xf32, #tpu.memory_space<vmem>>, %arg5: memref<192x128xf32, #tpu.memory_space<vmem>>, %arg6: memref<80x128xf32, #tpu.memory_space<vmem>>, %arg7: memref<1x128xf32, #tpu.memory_space<vmem>>, %arg8: memref<2x128xf32, #tpu.memory_space<vmem>>) attributes {dimension_semantics = [#tpu.dimension_semantics<parallel>], iteration_bounds = array<i64: 1>, scalar_prefetch = 0 : i64, scratch_operands = 0 : i64, tpu.core_type = #tpu.core_type<tc>, window_params = [{transform_indices = @transform_0, window_bounds = array<i64: 2, 192>}, {transform_indices = @transform_1, window_bounds = array<i64: 2, 192>}, {transform_indices = @transform_2, window_bounds = array<i64: 2, 80>}, {pipeline_mode = #tpu.pipeline_mode<synchronous>, transform_indices = @transform_3, window_bounds = array<i64: 192, 128>}, {pipeline_mode = #tpu.pipeline_mode<synchronous>, transform_indices = @transform_4, window_bounds = array<i64: 192, 128>}, {pipeline_mode = #tpu.pipeline_mode<synchronous>, transform_indices = @transform_5, window_bounds = array<i64: 80, 128>}, {pipeline_mode = #tpu.pipeline_mode<synchronous>, transform_indices = @transform_6, window_bounds = array<i64: 1, 128>}, {transform_indices = @transform_7, window_bounds = array<i64: 2, 128>}]} {
    %c0 = arith.constant 0 : index
    %c0_0 = arith.constant 0 : index
    %0 = vector.load %arg1[%c0, %c0_0] : memref<2x192xf32, #tpu.memory_space<vmem>>, vector<2x192xf32>
    %c0_1 = arith.constant 0 : index
    %c0_2 = arith.constant 0 : index
    %1 = vector.load %arg4[%c0_1, %c0_2] : memref<192x128xf32, #tpu.memory_space<vmem>>, vector<192x128xf32>
    %cst = arith.constant dense<0.000000e+00> : vector<2x128xf32>
    %2 = tpu.matmul %0, %1, %cst {dimension_numbers = #tpu.dot_dimension_numbers<[1], [0], [0], [1], [0, 0, 1, 1], [], []>} : vector<2x192xf32>, vector<192x128xf32>, vector<2x128xf32> -> vector<2x128xf32>
    %c0_3 = arith.constant 0 : index
    %c0_4 = arith.constant 0 : index
    %3 = vector.load %arg2[%c0_3, %c0_4] : memref<2x192xf32, #tpu.memory_space<vmem>>, vector<2x192xf32>
    %c0_5 = arith.constant 0 : index
    %c0_6 = arith.constant 0 : index
    %4 = vector.load %arg5[%c0_5, %c0_6] : memref<192x128xf32, #tpu.memory_space<vmem>>, vector<192x128xf32>
    %cst_7 = arith.constant dense<0.000000e+00> : vector<2x128xf32>
    %5 = tpu.matmul %3, %4, %cst_7 {dimension_numbers = #tpu.dot_dimension_numbers<[1], [0], [0], [1], [0, 0, 1, 1], [], []>} : vector<2x192xf32>, vector<192x128xf32>, vector<2x128xf32> -> vector<2x128xf32>
    %6 = arith.addf %2, %5 : vector<2x128xf32>
    %c0_8 = arith.constant 0 : index
    %c0_9 = arith.constant 0 : index
    %7 = vector.load %arg3[%c0_8, %c0_9] : memref<2x80xf32, #tpu.memory_space<vmem>>, vector<2x80xf32>
    %c0_10 = arith.constant 0 : index
    %c0_11 = arith.constant 0 : index
    %8 = vector.load %arg6[%c0_10, %c0_11] : memref<80x128xf32, #tpu.memory_space<vmem>>, vector<80x128xf32>
    %cst_12 = arith.constant dense<0.000000e+00> : vector<2x128xf32>
    %9 = tpu.matmul %7, %8, %cst_12 {dimension_numbers = #tpu.dot_dimension_numbers<[1], [0], [0], [1], [0, 0, 1, 1], [], []>} : vector<2x80xf32>, vector<80x128xf32>, vector<2x128xf32> -> vector<2x128xf32>
    %10 = arith.addf %6, %9 : vector<2x128xf32>
    %c0_13 = arith.constant 0 : index
    %c0_14 = arith.constant 0 : index
    %11 = vector.load %arg7[%c0_13, %c0_14] : memref<1x128xf32, #tpu.memory_space<vmem>>, vector<1x128xf32>
    %12 = vector.broadcast %11 : vector<1x128xf32> to vector<2x128xf32>
    %13 = arith.addf %10, %12 : vector<2x128xf32>
    %cst_15 = arith.constant dense<0xFF800000> : vector<2xf32>
    %14 = vector.multi_reduction <maximumf>, %13, %cst_15 [1] : vector<2x128xf32> to vector<2xf32>
    %15 = vector.shape_cast %14 : vector<2xf32> to vector<2x1xf32>
    %16 = vector.broadcast %15 : vector<2x1xf32> to vector<2x128xf32>
    %17 = arith.subf %13, %16 : vector<2x128xf32>
    %18 = math.exp %17 : vector<2x128xf32>
    %cst_16 = arith.constant dense<0.000000e+00> : vector<2xf32>
    %19 = vector.multi_reduction <add>, %18, %cst_16 [1] : vector<2x128xf32> to vector<2xf32>
    %20 = vector.shape_cast %19 : vector<2xf32> to vector<2x1xf32>
    %21 = tpu.reciprocal %20 {approx = true} : vector<2x1xf32> -> vector<2x1xf32>
    %22 = vector.broadcast %21 : vector<2x1xf32> to vector<2x128xf32>
    %23 = arith.mulf %18, %22 : vector<2x128xf32>
    %c0_17 = arith.constant 0 : index
    %c0_18 = arith.constant 0 : index
    %24 = vector.load %arg8[%c0_17, %c0_18] : memref<2x128xf32, #tpu.memory_space<vmem>>, vector<2x128xf32>
    tpu.vector_store %arg8[%c0_17, %c0_18], %23 {strides = array<i32>} : memref<2x128xf32, #tpu.memory_space<vmem>>, vector<2x128xf32>,
    return
  }
  func.func @transform_0(%arg0: i32) -> (i32, i32) {
    %c0_i32 = arith.constant 0 : i32
    %c0_i32_0 = arith.constant 0 : i32
    return %arg0, %c0_i32 : i32, i32
  }
  func.func @transform_1(%arg0: i32) -> (i32, i32) {
    %c0_i32 = arith.constant 0 : i32
    %c0_i32_0 = arith.constant 0 : i32
    return %arg0, %c0_i32 : i32, i32
  }
  func.func @transform_2(%arg0: i32) -> (i32, i32) {
    %c0_i32 = arith.constant 0 : i32
    %c0_i32_0 = arith.constant 0 : i32
    return %arg0, %c0_i32 : i32, i32
  }
  func.func @transform_3(%arg0: i32) -> (i32, i32) {
    %c0_i32 = arith.constant 0 : i32
    %c0_i32_0 = arith.constant 0 : i32
    %c0_i32_1 = arith.constant 0 : i32
    return %c0_i32, %c0_i32_0 : i32, i32
  }
  func.func @transform_4(%arg0: i32) -> (i32, i32) {
    %c0_i32 = arith.constant 0 : i32
    %c0_i32_0 = arith.constant 0 : i32
    %c0_i32_1 = arith.constant 0 : i32
    return %c0_i32, %c0_i32_0 : i32, i32
  }
  func.func @transform_5(%arg0: i32) -> (i32, i32) {
    %c0_i32 = arith.constant 0 : i32
    %c0_i32_0 = arith.constant 0 : i32
    %c0_i32_1 = arith.constant 0 : i32
    return %c0_i32, %c0_i32_0 : i32, i32
  }
  func.func @transform_6(%arg0: i32) -> (i32, i32) {
    %c0_i32 = arith.constant 0 : i32
    %c0_i32_0 = arith.constant 0 : i32
    %c0_i32_1 = arith.constant 0 : i32
    return %c0_i32, %c0_i32_0 : i32, i32
  }
  func.func @transform_7(%arg0: i32) -> (i32, i32) {
    %c0_i32 = arith.constant 0 : i32
    %c0_i32_0 = arith.constant 0 : i32
    return %arg0, %c0_i32 : i32, i32
  }
}

</mosaic_0001>

<bundles_post_ra>
// kernel: tpu_custom_call.1
= control target key start
LH: loop header
LB: loop body
LE: loop exit
PB: predicated region body
PF: predicated region fallthrough
CT: control target
= control target key end

     0   :  { %12 = vsyncpa [#allocation3], 0  ;;  %s604_s0 = inlined_call_operand.hbm [shape: f32[2,192], index: 0, kind: input, shape index: {}]   ;;  %s605_s1 = inlined_call_operand.hbm [shape: f32[2,192], index: 1, kind: input, shape index: {}]   ;;  %s606_s2 = inlined_call_operand.hbm [shape: f32[2,80], index: 2, kind: input, shape index: {}]   ;;  %s607_s3 = inlined_call_operand.hbm [shape: f32[192,128], index: 3, kind: input, shape index: {}]   ;;  %s608_s4 = inlined_call_operand.hbm [shape: f32[192,128], index: 4, kind: input, shape index: {}]   ;;  %s609_s5 = inlined_call_operand.hbm [shape: f32[80,128], index: 5, kind: input, shape index: {}]   ;;  %s610_s6 = inlined_call_operand.vmem [shape: f32[1,128], index: 6, kind: input, shape index: {}]   ;;  %s611_s7 = inlined_call_operand.hbm [shape: f32[2,128], index: 7, kind: output, shape index: {}]  }
   0x1   :  { %13 = vsyncpa [#allocation6], 0 }
   0x2   :  { %14 = vsyncpa [#allocation9], 0 }
   0x3   :  { %15 = vsyncpa [#allocation12], 0  ;;  %s33_s26 = sshll.u32 %s605_s1, 4  ;;  %s34_s26 = int_to_ptr.hbm [resolvable:$true] %s33_s26 }
   0x4   :  { %16 = vsyncpa [#allocation4], 0  ;;  %s529_s27 = smov [#allocation5]   ;;  %s54_s8 = sshll.u32 %s607_s3, 4  ;;  %s55_s8 = int_to_ptr.hbm [resolvable:$true] %s54_s8 }
   0x5   :  { %s35_s28 = sshll.u32 %s529_s27, 4  ;;  %s530_s9 = smov [#allocation8]   ;;  %s36_s28 = int_to_ptr.vmem [resolvable:$true] %s35_s28 }
   0x6   :  { %38 = dma.hbm_to_vmem [thread:$0]  %s34_s26, 64, %s36_s28, [#allocation6]  }
   0x7   :  { %s56_s10 = sshll.u32 %s530_s9, 4  ;;  %s531_s11 = smov 128   ;;  %s57_s10 = int_to_ptr.vmem [resolvable:$true] %s56_s10 }
   0x8   :  { %s532_s12 = smov 8   ;;  %s22_s1 = sshll.u32 %s604_s0, 4  ;;  %s23_s1 = int_to_ptr.hbm [resolvable:$true] %s22_s1 }
   0x9   :  { %62 = dma.hbm_to_vmem [thread:$0]  %s55_s8, 3072, %s57_s10, [#allocation9], %s531_s11, %s531_s11, %s532_s12  }
   0xa   :  { %s533_s15 = smov [#allocation2]   ;;  %s44_s3 = sshll.u32 %s606_s2, 4  ;;  %s45_s3 = int_to_ptr.hbm [resolvable:$true] %s44_s3 }
   0xb   :  { %s24_s16 = sshll.u32 %s533_s15, 4  ;;  %s534_s19 = smov [#allocation7]   ;;  %s25_s16 = int_to_ptr.vmem [resolvable:$true] %s24_s16 }
   0xc   :  { %27 = dma.hbm_to_vmem [thread:$0]  %s23_s1, 64, %s25_s16, [#allocation3]  }
   0xd   :  { %s46_s20 = sshll.u32 %s534_s19, 4  ;;  %s67_s23 = sshll.u32 %s608_s4, 4  ;;  %s47_s20 = int_to_ptr.vmem [resolvable:$true] %s46_s20  ;;  %s68_s23 = int_to_ptr.hbm [resolvable:$true] %s67_s23 }
   0xe   :  { %49 = dma.hbm_to_vmem [thread:$0]  %s45_s3, 32, %s47_s20, [#allocation6]  }
   0xf   :  { %s80_s25 = sshll.u32 %s609_s5, 4  ;;  %s535_s26 = smov [#allocation10]   ;;  %s81_s25 = int_to_ptr.hbm [resolvable:$true] %s80_s25 }
  0x10   :  { %s69_s27 = sshll.u32 %s535_s26, 4  ;;  %s536_s2 = smov [#allocation11]   ;;  %s70_s27 = int_to_ptr.vmem [resolvable:$true] %s69_s27 }
  0x11   :  { %75 = dma.hbm_to_vmem [thread:$0]  %s68_s23, 3072, %s70_s27, [#allocation9], %s531_s11, %s531_s11, %s532_s12  }
  0x12   :  { %s82_s28 = sshll.u32 %s536_s2, 4  ;;  %s83_s28 = int_to_ptr.vmem [resolvable:$true] %s82_s28 }
  0x13   :  { %88 = dma.hbm_to_vmem [thread:$0]  %s81_s25, 1280, %s83_s28, [#allocation12], %s531_s11, %s531_s11, %s532_s12  }
  0x14   :  { %519 = dma.done.wait [#allocation3], 64  }
  0x15   :  { %520 = vsyncadd [#allocation3], 4294967232 }
  0x16   :  { %521 = dma.done.wait [#allocation6], 96  }
  0x17   :  { %522 = vsyncadd [#allocation6], 4294967200 }
  0x18   :  { %523 = dma.done.wait [#allocation9], 6144  }
  0x19   :  { %524 = vsyncadd [#allocation9], 4294961152 }
  0x1a   :  { %525 = dma.done.wait [#allocation12], 1280  }
  0x1b   :  { %526 = vsyncadd [#allocation12], 4294966016  ;;  %v156_v0 = vld [vmem:[#allocation10 + $0x78] sm:$0xff]  ;;  %v155_v2 = vld [vmem:[#allocation10 + $0x70] sm:$0xff]  ;;  %vm170_vm0 = vcmask 523264   ;;  %vm271_vm1 = vcmask 654336  }
  0x1c   :  { %v131_v1 = vld [vmem:[#allocation8 + $0x78] sm:$0xff]  ;;  %173 = vmatpush.msra.mxu0 %v156_v0  ;;  %v130_v3 = vld [vmem:[#allocation8 + $0x70] sm:$0xff]  ;;  %v154_v5 = vld [vmem:[#allocation10 + $0x68] sm:$0xff]  ;;  %vm301_vm2 = vcmask 1041408   ;;  %s537_s29 = smov [#allocation13]  }
  0x1d   :  { %220 = vmatpush.msra.mxu2 %v131_v1  ;;  %v164_v4 = vld [vmem:[#allocation10 + $0xb8] sm:$0xff]  ;;  %v129_v6 = vld [vmem:[#allocation8 + $0x68] sm:$0xff]  ;;  %v163_v7 = vld [vmem:[#allocation10 + $0xb0] sm:$0xff]  ;;  %s319_s30 = sshll.u32 %s537_s29, 4  ;;  %s320_s30 = int_to_ptr.vmem [resolvable:$true] %s319_s30 }
  0x1e   :  { %201 = vmatpush.msra.mxu3 %v164_v4  ;;  %174 = vmatpush.msra.mxu0 %v155_v2  ;;  %v162_v8 = vld [vmem:[#allocation10 + $0xa8] sm:$0xff]  ;;  %v153_v9 = vld [vmem:[#allocation10 + $0x60] sm:$0xff]  ;;  %v152_v12 = vld [vmem:[#allocation10 + $0x58] sm:$0xff] }
  0x1f   :  { %221 = vmatpush.msra.mxu2 %v130_v3  ;;  %v128_v10 = vld [vmem:[#allocation8 + $0x60] sm:$0xff]  ;;  %v127_v13 = vld [vmem:[#allocation8 + $0x58] sm:$0xff]  ;;  %v151_v15 = vld [vmem:[#allocation10 + $0x50] sm:$0xff] }
  0x20   :  { %202 = vmatpush.msra.mxu3 %v163_v7  ;;  %175 = vmatpush.msra.mxu0 %v154_v5  ;;  %v161_v11 = vld [vmem:[#allocation10 + $0xa0] sm:$0xff]  ;;  %v160_v14 = vld [vmem:[#allocation10 + $0x98] sm:$0xff]  ;;  %v126_v16 = vld [vmem:[#allocation8 + $0x50] sm:$0xff] }
  0x21   :  { %222 = vmatpush.msra.mxu2 %v129_v6  ;;  %v159_v17 = vld [vmem:[#allocation10 + $0x90] sm:$0xff]  ;;  %v150_v18 = vld [vmem:[#allocation10 + $0x48] sm:$0xff]  ;;  %v149_v22 = vld [vmem:[#allocation10 + $0x40] sm:$0xff] }
  0x22   :  { %203 = vmatpush.msra.mxu3 %v162_v8  ;;  %176 = vmatpush.msra.mxu0 %v153_v9  ;;  %v125_v19 = vld [vmem:[#allocation8 + $0x48] sm:$0xff]  ;;  %v124_v23 = vld [vmem:[#allocation8 + $0x40] sm:$0xff]  ;;  %v140_v26 = vld [vmem:[#allocation5] sm:$0xf] }
  0x23   :  { %223 = vmatpush.msra.mxu2 %v128_v10  ;;  %v158_v20 = vld [vmem:[#allocation10 + $0x88] sm:$0xff]  ;;  %v157_v24 = vld [vmem:[#allocation10 + $0x80] sm:$0xff]  ;;  %v148_v27 = vld [vmem:[#allocation10 + $0x38] sm:$0xff]  ;;  %166 = vst [vmem:[#allocation1] ss:$4 sm:$0xff] %v140_v26 }
  0x24   :  { %204 = vmatpush.msra.mxu3 %v161_v11  ;;  %177 = vmatpush.msra.mxu0 %v152_v12  ;;  %v270_v21 = vld [vmem:[#allocation11 + $0x48] sm:$0xff]  ;;  %v269_v25 = vld [vmem:[#allocation11 + $0x40] sm:$0xff]  ;;  %v123_v28 = vld [vmem:[#allocation8 + $0x38] sm:$0xff] }
  0x25   :  { %224 = vmatpush.msra.mxu2 %v127_v13  ;;  %281 = vmatpush.msra.mxu1 %v270_v21  ;;  %v268_v29 = vld [vmem:[#allocation11 + $0x38] sm:$0xff]  ;;  %v147_v31 = vld [vmem:[#allocation10 + $0x30] sm:$0xff]  ;;  %v146_v34 = vld [vmem:[#allocation10 + $0x28] sm:$0xff] }
  0x26   :  { %205 = vmatpush.msra.mxu3 %v160_v14  ;;  %178 = vmatpush.msra.mxu0 %v151_v15  ;;  %v139_v30 = vld [vmem:[#allocation8 + $0xb8] sm:$0xff]  ;;  %v122_v32 = vld [vmem:[#allocation8 + $0x30] sm:$0xff]  ;;  %v266_v36 = vld [vmem:[#allocation11 + $0x28] sm:$0xff] }
  0x27   :  { %225 = vmatpush.msra.mxu2 %v126_v16  ;;  %282 = vmatpush.msra.mxu1 %v269_v25  ;;  %v267_v33 = vld [vmem:[#allocation11 + $0x30] sm:$0xff]  ;;  %v121_v37 = vld [vmem:[#allocation8 + $0x28] sm:$0xff]  ;;  %v145_v38 = vld [vmem:[#allocation10 + $0x20] sm:$0xff] }
  0x28   :  { %206 = vmatpush.msra.mxu3 %v159_v17  ;;  %179 = vmatpush.msra.mxu0 %v150_v18  ;;  %v138_v35 = vld [vmem:[#allocation8 + $0xb0] sm:$0xff]  ;;  %v120_v39 = vld [vmem:[#allocation8 + $0x20] sm:$0xff]  ;;  %v137_v40 = vld [vmem:[#allocation8 + $0xa8] sm:$0xff] }
  0x29   :  { %226 = vmatpush.msra.mxu2 %v125_v19  ;;  %283 = vmatpush.msra.mxu1 %v268_v29  ;;  %v115_v41 = vld [vmem:[#allocation2] sm:$0xf]  ;;  %v265_v42 = vld [vmem:[#allocation11 + $0x20] sm:$0xff]  ;;  %v262_v53 = vld [vmem:[#allocation11 + $0x8] sm:$0xff] }
  0x2a   :  { %207 = vmatpush.msra.mxu3 %v158_v20  ;;  %180 = vmatpush.msra.mxu0 %v149_v22  ;;  %v136_v43 = vld [vmem:[#allocation8 + $0xa0] sm:$0xff]  ;;  %v264_v44 = vld [vmem:[#allocation11 + $0x18] sm:$0xff]  ;;  %v167_v46 = vld.sshfl [vmem:[#allocation1] sm:$0xff pattern:$0x73625140] }
  0x2b   :  { %227 = vmatpush.msra.mxu2 %v124_v23  ;;  %284 = vmatpush.msra.mxu1 %v267_v33  ;;  %v168_v45 = vld.sshfl [vmem:[#allocation1 + $0x8] sm:$0xff pattern:$0x73625140]  ;;  %v142_v54 = vld [vmem:[#allocation10 + $0x8] sm:$0xff]  ;;  %v261_v57 = vld [vmem:[#allocation11] sm:$0xff] }
  0x2c   :  { %208 = vmatpush.msra.mxu3 %v157_v24  ;;  %181 = vmatpush.msra.mxu0 %v148_v27  ;;  %v144_v47 = vld [vmem:[#allocation10 + $0x18] sm:$0xff]  ;;  %214 = vst [vmem:[#allocation1] ss:$4 sm:$0xff] %v115_v41  ;;  %v263_v49 = vld [vmem:[#allocation11 + $0x10] sm:$0xff]  ;;  %v117_v55 = vld [vmem:[#allocation8 + $0x8] sm:$0xff] }
  0x2d   :  { %228 = vmatpush.msra.mxu2 %v123_v28  ;;  %285 = vmatpush.msra.mxu1 %v266_v36  ;;  %v119_v48 = vld [vmem:[#allocation8 + $0x18] sm:$0xff]  ;;  %v143_v50 = vld [vmem:[#allocation10 + $0x10] sm:$0xff]  ;;  %v141_v58 = vld [vmem:[#allocation10] sm:$0xff] }
  0x2e   :  { %248 = vmatpush.msrb.mxu3 %v139_v30  ;;  %182 = vmatpush.msra.mxu0 %v147_v31  ;;  %v118_v51 = vld [vmem:[#allocation8 + $0x10] sm:$0xff]  ;;  %v135_v52 = vld [vmem:[#allocation8 + $0x98] sm:$0xff]  ;;  %v116_v59 = vld [vmem:[#allocation8] sm:$0xff] }
  0x2f   :  { %229 = vmatpush.msra.mxu2 %v122_v32  ;;  %286 = vmatpush.msra.mxu1 %v265_v42  ;;  %v134_v56 = vld [vmem:[#allocation8 + $0x90] sm:$0xff]  ;;  %v133_v60 = vld [vmem:[#allocation8 + $0x88] sm:$0xff]  ;;  %v260_v62 = vld [vmem:[#allocation7] sm:$0x3] }
  0x30   :  { %249 = vmatpush.msrb.mxu3 %v138_v35  ;;  %183 = vmatpush.msra.mxu0 %v146_v34  ;;  %v132_v63 = vld [vmem:[#allocation8 + $0x80] sm:$0xff]  ;;  %v346_v9 = vld [vmem:[%s610_s6] ss:$0 sm:$0xff]  ;;  %s321_s6 = sshll.u32 %s611_s7, 4  ;;  %s322_s6 = int_to_ptr.hbm [resolvable:$true] %s321_s6 }
  0x31   :  { %230 = vmatpush.msra.mxu2 %v121_v37  ;;  %287 = vmatpush.msra.mxu1 %v264_v44 }
  0x32   :  { %250 = vmatpush.msrb.mxu3 %v137_v40  ;;  %184 = vmatpush.msra.mxu0 %v145_v38 }
  0x33   :  { %231 = vmatpush.msra.mxu2 %v120_v39  ;;  %334 = vmatmul.msk.f32.vlgmr.msra.gmra.mxu3 %vm170_vm0, %v168_v45  ;;  %v215_v61 = vld.sshfl [vmem:[#allocation1] sm:$0xff pattern:$0x73625140]  ;;  %v216_v0 = vld.sshfl [vmem:[#allocation1 + $0x8] sm:$0xff pattern:$0x73625140] }
  0x34   :  { %251 = vmatpush.msrb.mxu3 %v136_v43  ;;  %185 = vmatpush.msra.mxu0 %v144_v47 }
  0x35   :  { %232 = vmatpush.msra.mxu2 %v119_v48  ;;  %288 = vmatpush.msra.mxu1 %v263_v49 }
  0x36   :  { %186 = vmatpush.msra.mxu0 %v143_v50  ;;  %252 = vmatpush.msrb.mxu3 %v135_v52 }
  0x37   :  { %233 = vmatpush.msra.mxu2 %v118_v51  ;;  %289 = vmatpush.msra.mxu1 %v262_v53 }
  0x38   :  { %187 = vmatpush.msra.mxu0 %v142_v54  ;;  %253 = vmatpush.msrb.mxu3 %v134_v56 }
  0x39   :  { %234 = vmatpush.msra.mxu2 %v117_v55  ;;  %290 = vmatpush.msra.mxu1 %v261_v57 }
  0x3a   :  { %188 = vmatpush.msra.mxu0 %v141_v58  ;;  %254 = vmatpush.msrb.mxu3 %v133_v60 }
  0x3b   :  { %235 = vmatpush.msra.mxu2 %v116_v59  ;;  %189 = vmatmul.f32.vlgmr.msra.gmra.mxu0 %v167_v46 }
  0x3c   :  { %236 = vmatmul.f32.vlgmr.msra.gmra.mxu2 %v215_v61  ;;  %336 = vmatmul.msk.f32.vlgmr.msra.gmra.mxu1 %vm271_vm1, %v260_v62 }
  0x3d   :  { %255 = vmatpush.msrb.mxu3 %v132_v63 }
  0x3e   :  { %335 = vmatmul.msk.f32.vlgmr.msrb.gmra.mxu3 %vm170_vm0, %v216_v0 }
  0xb6   :  { %v210_v1 = vpop.f32.mrf.mxu3 }
  0xb8   :  { %v190_v2 = vpop.f32.mrf.mxu0 }
  0xb9   :  { %v211_v3 = vadd.f32 %v210_v1, %v190_v2  ;;  %v292_v7 = vpop.f32.mrf.mxu1 }
  0xbf   :  { %v237_v4 = vpop.f32.mrf.mxu2 }
  0xc0   :  { %v238_v5 = vadd.f32 %v237_v4, %v211_v3 }
  0xc1   :  { %v257_v6 = vpop.f32.mrf.mxu3 }
  0xc2   :  { %v258_v8 = vadd.f32 %v257_v6, %v238_v5 }
  0xc4   :  { %v295_v10 = vadd.f32 %v292_v7, %v258_v8 }
  0xc6   :  { %v300_v11 = vadd.f32 %v346_v9, %v295_v10 }
  0xc8   :  { %v302_v12 = vsel %vm301_vm2, %v300_v11, -inf }
  0xc9   :  { %303 = vmax.xlane.f32.xlu0 %v302_v12 }
 0x13c   :  { %v304_v13 = vpop.xlane.xlu0 %303 }
 0x13d   :  { %v305_v14 = vsub.f32 %v300_v11, %v304_v13 }
 0x13f   :  { %v306_v15 = vmul.f32 1.442695, %v305_v14 }
 0x141   :  { %347 = vpow2.f32 %v306_v15 }
 0x147   :  { %v348_v16 = vpop.eup %347 }
 0x148   :  { %v308_v17 = vsel %vm301_vm2, %v348_v16, 0.0 }
 0x149   :  { %309 = vadd.xlane.f32.xlu0 %v308_v17 }
 0x1bc   :  { %v310_v18 = vpop.xlane.xlu0 %309 }
 0x1bd   :  { %349 = vrcp.f32 %v310_v18 }
 0x1c3   :  { %v350_v19 = vpop.eup %349 }
 0x1c4   :  { %v312_v20 = vmul.f32 %v350_v19, %v348_v16 }
 0x1c6   :  { %313 = vst [vmem:[#allocation13] sm:$0x3] %v312_v20 }
 0x1c7   :  { %324 = dma.vmem_to_hbm [thread:$0]  %s320_s30, 32, %s322_s6, [#allocation4]  }
 0x1c8   :  { %527 = dma.done.wait [#allocation4], 32  }
 0x1c9   :  { %528 = vsyncadd [#allocation4], 4294967264 }
 0x1ca   :  { %329 = vsyncpa [#allocation3], 1 }
 0x1cb   :  { %330 = vsyncpa [#allocation6], 1 }
 0x1cc   :  { %331 = vsyncpa [#allocation9], 1 }
 0x1cd   :  { %332 = vsyncpa [#allocation12], 1 }
 0x1ce   :  { %333 = vsyncpa [#allocation4], 1 }

</bundles_post_ra>
